<compile_context>
chip_gen: v7x
topology: tpu7x:2x2x1
jax: 0.10.0
libtpu: 0.0.40
codegen_flags: <defaults>
</compile_context>

<pallas_src>
import functools

import jax
import jax.numpy as jnp
from jax import lax
from jax.experimental import pallas as pl
from jax.experimental.pallas import tpu as pltpu


def _round_up(x, m):
    return ((x + m - 1) // m) * m


# -----------------------------------------------------------------------------
# Kernels
# -----------------------------------------------------------------------------
def _linear_kernel(x_ref, w_ref, b_ref, o_ref):
    """Resident-weight variant: full K in a single dot, no scratch."""
    o_ref[...] = (
        jnp.dot(x_ref[...], w_ref[...], preferred_element_type=jnp.float32)
        + b_ref[...]
    ).astype(o_ref.dtype)


def _linear_kernel_ktiled(x_ref, w_ref, b_ref, o_ref, acc_ref, *, k_total, tk):
    """K-streaming variant for very large nfeat (weight does not fit VMEM)."""
    k = pl.program_id(1)

    @pl.when(k == 0)
    def _():
        # Seed the accumulator with the broadcast bias so finalize is a plain
        # cast+store (no extra add / re-broadcast per row tile).
        acc_ref[...] = jnp.broadcast_to(b_ref[...], acc_ref.shape)

    x = x_ref[...]
    if k_total % tk != 0:
        # x is NOT padded in HBM: the last K tile reads past the feature dim
        # and those lanes are undefined.  Mask them to zero (the weight's K
        # padding is zero, but 0 * NaN would still poison the accumulator).
        col = lax.broadcasted_iota(jnp.int32, x.shape, 1) + k * tk
        x = jnp.where(col < k_total, x, jnp.zeros_like(x))

    acc_ref[...] += jnp.dot(x, w_ref[...], preferred_element_type=jnp.float32)

    @pl.when(k == pl.num_programs(1) - 1)
    def _():
        o_ref[...] = acc_ref[...].astype(o_ref.dtype)


# -----------------------------------------------------------------------------
# Tiling helpers
# -----------------------------------------------------------------------------
def _vmem_budgets():
    """Generation-aware VMEM limits (v5e/v6e: 128 MiB, v7x: 64 MiB physical)."""
    cap = 64 * 1024 * 1024  # conservative default = v7x physical VMEM
    try:
        cap = int(pltpu.get_tpu_info().vmem_capacity_bytes)
    except Exception:
        # Hardware query unavailable (e.g. interpret mode); keep the safe default.
        pass
    vmem_limit = cap * 3 // 4          # headroom for Mosaic internals
    tile_budget = vmem_limit * 2 // 3  # per-grid-step working-set budget
    return vmem_limit, tile_budget


def _pick_tm(n_rows, candidates, step_bytes_fn, budget):
    fitting = [t for t in candidates if step_bytes_fn(t) <= budget]
    if not fitting:
        return None
    tm = fitting[0]
    g = pl.cdiv(n_rows, tm)
    # v7x shards the "parallel" row axis across 2 TensorCores: with few row
    # steps prefer an even count so neither core idles, as long as the tile
    # stays MXU-friendly (>= 256 rows).
    if g % 2 == 1 and 1 < g <= 7:
        for t in fitting[1:]:
            if t >= 256 and pl.cdiv(n_rows, t) % 2 == 0:
                return t
    return tm


# -----------------------------------------------------------------------------
# Wrapper
# -----------------------------------------------------------------------------
def factor_forward(
    x,
    w_t,
    b,
    *,
    max_resident_weight_bytes=8 * 1024 * 1024,
    force_k_tile=None,  # debug/testing knob: force the K-streaming path with this tk
):
    """Compute x @ w_t + b (PyTorch nn.Linear forward) with a Pallas TPU kernel.

    x:   [N, nfeat]   -- never padded/copied/cast here (it dominates HBM traffic)
    w_t: [nfeat, nhid] (transposed PyTorch Linear weight)
    b:   [nhid]
    The output dtype matches x's dtype; accumulation is float32.
    """
    N, K = x.shape
    Kw, Nout = w_t.shape
    assert K == Kw, "weight / input feature mismatch"
    out_dtype = x.dtype

    # The weight is tiny: match it to x's storage dtype (bf16 x -> bf16 weight
    # for MXU throughput / halved weight traffic).  x itself is never cast --
    # an HBM-bound kernel cannot afford an extra pass over x just to round it.
    w_t = w_t.astype(x.dtype)
    b = b.astype(jnp.float32)

    x_item = jnp.dtype(x.dtype).itemsize
    w_item = x_item
    out_item = jnp.dtype(out_dtype).itemsize

    vmem_limit, tile_budget = _vmem_budgets()
    Nout_pad = _round_up(Nout, 128)

    # Row-tile candidates: big tiles first (v6e/v7x MXU is 256 wide, per-step
    # overhead ~0.35us); never below 128 rows just to manufacture pipeline
    # steps; a single full-height tile is fine for small N.
    if N <= 256:
        tm_candidates = [N]
    else:
        tm_candidates = [t for t in (1024, 512, 256, 128) if t <= N]

    w_resident_bytes = K * Nout_pad * w_item
    use_resident = (force_k_tile is None) and (
        w_resident_bytes <= min(max_resident_weight_bytes, tile_budget // 3)
    )

    tm = None
    if use_resident:
        def step_bytes_res(t):
            return (
                2 * t * K * x_item              # x tile, double-buffered
                + 2 * w_resident_bytes          # weight (grid-invariant)
                + 2 * Nout_pad * 4              # bias row
                + 2 * t * Nout_pad * out_item   # output tile, double-buffered
            )

        tm = _pick_tm(N, tm_candidates, step_bytes_res, tile_budget)
        if tm is None:
            use_resident = False  # fall back to K streaming

    if use_resident:
        grid0 = pl.cdiv(N, tm)
        w_p = jnp.pad(w_t, ((0, 0), (0, Nout_pad - Nout)))
        b_p = jnp.pad(b, (0, Nout_pad - Nout)).reshape(1, Nout_pad)

        cost = pl.CostEstimate(
            flops=2 * N * K * Nout_pad,
            transcendentals=0,
            bytes_accessed=(
                N * K * x_item + K * Nout_pad * w_item
                + Nout_pad * 4 + N * Nout_pad * out_item
            ),
        )

        out_p = pl.pallas_call(
            _linear_kernel,
            out_shape=jax.ShapeDtypeStruct((N, Nout_pad), out_dtype),
            grid_spec=pltpu.PrefetchScalarGridSpec(
                num_scalar_prefetch=0,
                grid=(grid0,),
                in_specs=[
                    pl.BlockSpec((tm, K), lambda i: (i, 0)),          # x row tile
                    pl.BlockSpec((K, Nout_pad), lambda i: (0, 0)),    # resident weight
                    pl.BlockSpec((1, Nout_pad), lambda i: (0, 0)),    # bias
                ],
                out_specs=pl.BlockSpec((tm, Nout_pad), lambda i: (i, 0)),
            ),
            compiler_params=pltpu.CompilerParams(
                dimension_semantics=("parallel",),
                vmem_limit_bytes=vmem_limit,
            ),
            cost_estimate=cost,
        )(x, w_p, b_p)
    else:
        tk = force_k_tile if force_k_tile is not None else 512
        tk = min(tk, _round_up(K, 128))
        num_k = pl.cdiv(K, tk)
        K_pad = num_k * tk

        def step_bytes_kt(t):
            return (
                2 * t * tk * x_item             # x tile, double-buffered
                + 2 * tk * Nout_pad * w_item    # weight K-slab, double-buffered
                + 2 * Nout_pad * 4              # bias row
                + t * Nout_pad * out_item       # output: resident across K
                + t * Nout_pad * 4              # f32 accumulator scratch
            )

        tm = _pick_tm(N, tm_candidates, step_bytes_kt, tile_budget)
        if tm is None:
            tm = tm_candidates[-1]
        grid0 = pl.cdiv(N, tm)

        # Only the small weight/bias get padded (zeros along K are exact).
        w_p = jnp.pad(w_t, ((0, K_pad - K), (0, Nout_pad - Nout)))
        b_p = jnp.pad(b, (0, Nout_pad - Nout)).reshape(1, Nout_pad)

        cost = pl.CostEstimate(
            flops=2 * N * K_pad * Nout_pad,
            transcendentals=0,
            bytes_accessed=(
                N * K * x_item + K_pad * Nout_pad * w_item
                + Nout_pad * 4 + N * Nout_pad * out_item
            ),
        )

        kernel = functools.partial(_linear_kernel_ktiled, k_total=K, tk=tk)
        out_p = pl.pallas_call(
            kernel,
            out_shape=jax.ShapeDtypeStruct((N, Nout_pad), out_dtype),
            grid_spec=pltpu.PrefetchScalarGridSpec(
                num_scalar_prefetch=0,
                grid=(grid0, num_k),
                in_specs=[
                    pl.BlockSpec((tm, tk), lambda i, k: (i, k)),          # x tile
                    pl.BlockSpec((tk, Nout_pad), lambda i, k: (k, 0)),    # weight slab
                    pl.BlockSpec((1, Nout_pad), lambda i, k: (0, 0)),     # bias
                ],
                out_specs=pl.BlockSpec((tm, Nout_pad), lambda i, k: (i, 0)),
                scratch_shapes=[pltpu.VMEM((tm, Nout_pad), jnp.float32)],
            ),
            compiler_params=pltpu.CompilerParams(
                dimension_semantics=("parallel", "arbitrary"),
                vmem_limit_bytes=vmem_limit,
            ),
            cost_estimate=cost,
        )(x, w_p, b_p)

    # Slice off the lane padding (no-op when nhid is already a 128-multiple).
    return out_p[:, :Nout]


# -----------------------------------------------------------------------------
# Demo / self-check
# -----------------------------------------------------------------------------
if __name__ == "__main__":
    # Small but deliberately "ragged" shapes (not multiples of 8/128) to
    # exercise partial row tiles, the K tail mask and the lane padding.
    nfeat = 200
    nhid = 48
    N = 300

    key = jax.random.PRNGKey(0)
    kx, kw, kb = jax.random.split(key, 3)

    # Synthetic params at PyTorch Linear init scale U(-1/sqrt(nfeat), 1/sqrt(nfeat)).
    bound = 1.0 / (nfeat ** 0.5)
    w = jax.random.uniform(kw, (nhid, nfeat), jnp.float32, -bound, bound)  # [out, in]
    b = jax.random.uniform(kb, (nhid,), jnp.float32, -bound, bound)
    x = jax.random.normal(kx, (N, nfeat), jnp.float32)
    w_t = w.T  # kernel takes the weight pre-transposed to [nfeat, nhid]

    fwd = jax.jit(
        factor_forward,
        static_argnames=("max_resident_weight_bytes", "force_k_tile"),
    )

    # Full-precision reference.
    ref = jnp.dot(x, w.T, precision=jax.lax.Precision.HIGHEST) + b

    # 1) Resident-weight single-K-step path (the common Factor case).
    out = jax.block_until_ready(fwd(x, w_t, b))
    assert out.shape == (N, nhid)
    assert jnp.allclose(out, ref, atol=1e-3, rtol=1e-3)

    # 2) K-streaming path with an unaligned K tail (forced, for coverage).
    out_kt = jax.block_until_ready(fwd(x, w_t, b, force_k_tile=128))
    assert out_kt.shape == (N, nhid)
    assert jnp.allclose(out_kt, ref, atol=1e-3, rtol=1e-3)

    # 3) x already stored as bf16 (the wrapper never casts x; the weight follows
    #    x's dtype, accumulation stays f32).  Looser tolerance only because the
    #    operands/output are bf16.
    out_bf = jax.block_until_ready(fwd(x.astype(jnp.bfloat16), w_t, b))
    assert out_bf.shape == (N, nhid)
    assert jnp.allclose(out_bf.astype(jnp.float32), ref, atol=5e-2, rtol=5e-2)

    print("KERNEL_OK")
</pallas_src>

<mosaic_0001>
module attributes {stable_mosaic.version = 11 : i64} {
  func.func @_linear_kernel(%arg0: i32, %arg1: memref<256x200xf32, #tpu.memory_space<vmem>>, %arg2: memref<200x128xf32, #tpu.memory_space<vmem>>, %arg3: memref<1x128xf32, #tpu.memory_space<vmem>>, %arg4: memref<256x128xf32, #tpu.memory_space<vmem>>) attributes {dimension_semantics = [#tpu.dimension_semantics<parallel>], iteration_bounds = array<i64: 2>, scalar_prefetch = 0 : i64, scratch_operands = 0 : i64, tpu.core_type = #tpu.core_type<tc>, window_params = [{transform_indices = @transform_0, window_bounds = array<i64: 256, 200>}, {pipeline_mode = #tpu.pipeline_mode<synchronous>, transform_indices = @transform_1, window_bounds = array<i64: 200, 128>}, {pipeline_mode = #tpu.pipeline_mode<synchronous>, transform_indices = @transform_2, window_bounds = array<i64: 1, 128>}, {transform_indices = @transform_3, window_bounds = array<i64: 256, 128>}]} {
    %c0 = arith.constant 0 : index
    %c0_0 = arith.constant 0 : index
    %0 = vector.load %arg1[%c0, %c0_0] : memref<256x200xf32, #tpu.memory_space<vmem>>, vector<256x200xf32>
    %c0_1 = arith.constant 0 : index
    %c0_2 = arith.constant 0 : index
    %1 = vector.load %arg2[%c0_1, %c0_2] : memref<200x128xf32, #tpu.memory_space<vmem>>, vector<200x128xf32>
    %cst = arith.constant dense<0.000000e+00> : vector<256x128xf32>
    %2 = tpu.matmul %0, %1, %cst {dimension_numbers = #tpu.dot_dimension_numbers<[1], [0], [0], [1], [0, 0, 1, 1], [], []>} : vector<256x200xf32>, vector<200x128xf32>, vector<256x128xf32> -> vector<256x128xf32>
    %c0_3 = arith.constant 0 : index
    %c0_4 = arith.constant 0 : index
    %3 = vector.load %arg3[%c0_3, %c0_4] : memref<1x128xf32, #tpu.memory_space<vmem>>, vector<1x128xf32>
    %4 = vector.broadcast %3 : vector<1x128xf32> to vector<256x128xf32>
    %5 = arith.addf %2, %4 : vector<256x128xf32>
    %c0_5 = arith.constant 0 : index
    %c0_6 = arith.constant 0 : index
    %6 = vector.load %arg4[%c0_5, %c0_6] : memref<256x128xf32, #tpu.memory_space<vmem>>, vector<256x128xf32>
    tpu.vector_store %arg4[%c0_5, %c0_6], %5 {strides = array<i32>} : memref<256x128xf32, #tpu.memory_space<vmem>>, vector<256x128xf32>,
    return
  }
  func.func @transform_0(%arg0: i32) -> (i32, i32) {
    %c0_i32 = arith.constant 0 : i32
    %c0_i32_0 = arith.constant 0 : i32
    return %arg0, %c0_i32 : i32, i32
  }
  func.func @transform_1(%arg0: i32) -> (i32, i32) {
    %c0_i32 = arith.constant 0 : i32
    %c0_i32_0 = arith.constant 0 : i32
    %c0_i32_1 = arith.constant 0 : i32
    return %c0_i32, %c0_i32_0 : i32, i32
  }
  func.func @transform_2(%arg0: i32) -> (i32, i32) {
    %c0_i32 = arith.constant 0 : i32
    %c0_i32_0 = arith.constant 0 : i32
    %c0_i32_1 = arith.constant 0 : i32
    return %c0_i32, %c0_i32_0 : i32, i32
  }
  func.func @transform_3(%arg0: i32) -> (i32, i32) {
    %c0_i32 = arith.constant 0 : i32
    %c0_i32_0 = arith.constant 0 : i32
    return %arg0, %c0_i32 : i32, i32
  }
}

</mosaic_0001>

<bundles_post_ra>
// kernel: factor_forward.1
= control target key start
LH: loop header
LB: loop body
LE: loop exit
PB: predicated region body
PF: predicated region fallthrough
CT: control target
= control target key end

     0   :  { %s1313_s12 = smov 0   ;;  %s1315_s13 = smov 0   ;;  %s1758_s0 = inlined_call_operand.vmem [shape: f32[300,200], index: 0, kind: input, shape index: {}]   ;;  %s1759_s1 = inlined_call_operand.vmem [shape: f32[200,128], index: 1, kind: input, shape index: {}]   ;;  %s1760_s2 = inlined_call_operand.vmem [shape: f32[1,128], index: 2, kind: input, shape index: {}]   ;;  %s1761_s3 = inlined_call_operand.vmem [shape: f32[300,128], index: 3, kind: output, shape index: {}]  }
   0x1   :  { %s1317_s14 = smov 0  }
   0x2 LB: > { %s1326_s15 = sadd.s32 4294967295, %s1257_s14   ;;  %s1328_s16 = sadd.s32 1, %s1257_s14   ;;  %s1257_s14 = sphi %s1317_s14, %s1770_s14   ;;  %s1253_s13 = sphi %s1315_s13, %s1769_s13   ;;  %s1249_s12 = sphi %s1313_s12, %s1768_s12  }
   0x3   : > { %s85_s17 = ssub.s32 %s1257_s14, %s1328_s16  ;;  %s88_s18 = sadd.s32 1, %s1253_s13 }
   0x4   : > { %p86_p0 = scmp.eq.s32.totalorder %s85_s17, 0  ;;  %p98_p1 = scmp.ne.s32.totalorder %s1253_s13, %s1249_s12 }
   0x5   : > { %p99_p2 = scmp.eq.s32.totalorder %s1326_s15, 1  ;;  %p992_p3 = scmp.ge.s32.totalorder %s1257_s14, 1 }
   0x6   : > { %s1336_s19 = scalar_select %p86_p0, %s1253_s13, %s88_s18  }
   0x7   : > { %p1338_p4 = por %p99_p2, %p98_p1  ;;  %p149_p5 = scmp.lt.s32.totalorder %s1257_s14, 3 }
   0x9   : > { %p150_p6 = pnand %p992_p3, %p149_p5 }
   0xa   : > { %v264_v0 = vld [vmem:[%s1759_s1] sm:$0xff] (!%p150_p6)  ;;  %v265_v1 = vld [vmem:[%s1759_s1 + $0x8] sm:$0xff] (!%p150_p6)  ;;  %v266_v2 = vld [vmem:[%s1759_s1 + $0x10] sm:$0xff] (!%p150_p6)  ;;  %s1352_s27 = sshll.u32 (!%p150_p6), %s1326_s15, 5  ;;  %v1291_v3 = vmov (!%p150_p6), 0.0|0.0   ;;  %vm296_vm0 = vcmask (!%p150_p6), 588800  }
   0xb   : > { %153 = sbr.rel (%p150_p6) target bundleno = 393 (0x189), region = 32  ;;  %1051 = vmatprep.subr.bf16.mxu0 (!%p150_p6), %v1291_v3  ;;  %1087 = vmatprep.subr.bf16.mxu1 (!%p150_p6), %v1291_v3  ;;  %v1052_v4 = vpack.c.bf16 (!%p150_p6), %v265_v1, %v264_v0  ;;  %v267_v5 = vld [vmem:[%s1759_s1 + $0x18] sm:$0xff] (!%p150_p6)  ;;  %p184_p7 = scmp.lt.s32.totalorder (!%p150_p6), %s1352_s27, 37  ;;  %v268_v7 = vld [vmem:[%s1759_s1 + $0x20] sm:$0xff] (!%p150_p6)  ;;  %v269_v8 = vld [vmem:[%s1759_s1 + $0x28] sm:$0xff] (!%p150_p6)  ;;  %v1292_v39 = vmov (!%p150_p6), 0.0  }
   0xc   : > { %v1055_v6 = vpack.c.bf16 (!%p150_p6), %v267_v5, %v266_v2  ;;  %v1058_v9 = vpack.c.bf16 (!%p150_p6), %v269_v8, %v268_v7  ;;  %v270_v10 = vld [vmem:[%s1759_s1 + $0x30] sm:$0xff] (!%p150_p6)  ;;  %v271_v11 = vld [vmem:[%s1759_s1 + $0x38] sm:$0xff] (!%p150_p6)  ;;  %v272_v15 = vld [vmem:[%s1759_s1 + $0x40] sm:$0xff] (!%p150_p6)  ;;  %s175_s14 = sand.u32 (!%p150_p6), 1, %s1249_s12  }
   0xd   : > { %1053 = vmatpush1.bf16.msra.mxu0 (!%p150_p6), %v1052_v4  ;;  %1100 = vmatpush1.bf16.msra.mxu1 (!%p150_p6), %v1052_v4  ;;  %v1061_v14 = vpack.c.bf16 (!%p150_p6), %v271_v11, %v270_v10  ;;  %v273_v16 = vld [vmem:[%s1759_s1 + $0x48] sm:$0xff] (!%p150_p6)  ;;  %v274_v18 = vld [vmem:[%s1759_s1 + $0x50] sm:$0xff] (!%p150_p6)  ;;  %v275_v19 = vld [vmem:[%s1759_s1 + $0x58] sm:$0xff] (!%p150_p6)  ;;  %s993_s17 = sshll.u32 (!%p150_p6), %s175_s14, 8 }
   0xe   : > { %1054 = vmatprep.subr.bf16.mxu0 (!%p150_p6), %v1291_v3  ;;  %1088 = vmatprep.subr.bf16.mxu1 (!%p150_p6), %v1291_v3  ;;  %v1064_v17 = vpack.c.bf16 (!%p150_p6), %v273_v16, %v272_v15  ;;  %v1067_v20 = vpack.c.bf16 (!%p150_p6), %v275_v19, %v274_v18  ;;  %v276_v21 = vld [vmem:[%s1759_s1 + $0x60] sm:$0xff] (!%p150_p6)  ;;  %v277_v22 = vld [vmem:[%s1759_s1 + $0x68] sm:$0xff] (!%p150_p6)  ;;  %v278_v24 = vld [vmem:[%s1759_s1 + $0x70] sm:$0xff] (!%p150_p6)  ;;  %s1555_s22 = scalar_lea.vmem (!%p150_p6), [#allocation2], %s993_s17  }
   0xf   : > { %v1070_v23 = vpack.c.bf16 (!%p150_p6), %v277_v22, %v276_v21  ;;  %v279_v25 = vld [vmem:[%s1759_s1 + $0x78] sm:$0xff] (!%p150_p6)  ;;  %v280_v27 = vld [vmem:[%s1759_s1 + $0x80] sm:$0xff] (!%p150_p6)  ;;  %v281_v28 = vld [vmem:[%s1759_s1 + $0x88] sm:$0xff] (!%p150_p6) }
  0x10   : > { %v1073_v26 = vpack.c.bf16 (!%p150_p6), %v279_v25, %v278_v24  ;;  %v1076_v29 = vpack.c.bf16 (!%p150_p6), %v281_v28, %v280_v27  ;;  %v282_v30 = vld [vmem:[%s1759_s1 + $0x90] sm:$0xff] (!%p150_p6)  ;;  %v283_v31 = vld [vmem:[%s1759_s1 + $0x98] sm:$0xff] (!%p150_p6)  ;;  %v284_v33 = vld [vmem:[%s1759_s1 + $0xa0] sm:$0xff] (!%p150_p6) }
  0x11   : > { %1056 = vmatpush1.bf16.msra.mxu0 (!%p150_p6), %v1055_v6  ;;  %1101 = vmatpush1.bf16.msra.mxu1 (!%p150_p6), %v1055_v6  ;;  %v1079_v32 = vpack.c.bf16 (!%p150_p6), %v283_v31, %v282_v30  ;;  %v285_v34 = vld [vmem:[%s1759_s1 + $0xa8] sm:$0xff] (!%p150_p6)  ;;  %v286_v36 = vld [vmem:[%s1759_s1 + $0xb0] sm:$0xff] (!%p150_p6)  ;;  %v287_v37 = vld [vmem:[%s1759_s1 + $0xb8] sm:$0xff] (!%p150_p6) }
  0x12   : > { %s185_s30 = scalar_select %p184_p7, %s1352_s27, 37  ;;  %1057 = vmatprep.subr.bf16.mxu0 %v1291_v3  ;;  %1089 = vmatprep.subr.bf16.mxu1 %v1291_v3  ;;  %v1082_v35 = vpack.c.bf16 %v285_v34, %v284_v33  ;;  %v1085_v38 = vpack.c.bf16 %v287_v37, %v286_v36  ;;  %v288_v40 = vld [vmem:[%s1759_s1 + $0xc0] sm:$0xff] }
  0x13   : > { %s658_s12 = ssub.s32 (%p1338_p4), 38, %s1352_s27 }
  0x14   : > { %s1047_s8 = sshll.u32 %s185_s30, 4  ;;  %p659_p8 = scmp.lt.s32.totalorder (%p1338_p4), %s658_s12, 32 }
  0x15   : > { %s1372_s11 = scalar_lea.vmem %s1758_s0, %s1047_s8  ;;  %1059 = vmatpush1.bf16.msra.mxu0 %v1058_v9  ;;  %1102 = vmatpush1.bf16.msra.mxu1 %v1058_v9 }
  0x16   : > { %v201_v12 = vld [vmem:[%s1372_s11 + $0x8] sm:$0xff]  ;;  %1060 = vmatprep.subr.bf16.mxu0 %v1291_v3  ;;  %1090 = vmatprep.subr.bf16.mxu1 %v1291_v3  ;;  %v200_v41 = vld [vmem:[%s1372_s11] sm:$0xff]  ;;  %v203_v43 = vld [vmem:[%s1372_s11 + $0x18] sm:$0xff] }
  0x17   : > { %v233_v13 = vld [vmem:[%s1372_s11 + $0x108] sm:$0xff]  ;;  %998 = vmatprep.mubr.msk.f32.mxu0 %vm296_vm0, %v201_v12  ;;  %v232_v42 = vld [vmem:[%s1372_s11 + $0x100] sm:$0xff]  ;;  %v235_v44 = vld [vmem:[%s1372_s11 + $0x118] sm:$0xff] }
  0x18   : > { %1014 = vmatprep.mubr.msk.f32.mxu1 %vm296_vm0, %v233_v13  ;;  %v202_v45 = vld [vmem:[%s1372_s11 + $0x10] sm:$0xff]  ;;  %v205_v47 = vld [vmem:[%s1372_s11 + $0x28] sm:$0xff]  ;;  %v204_v49 = vld [vmem:[%s1372_s11 + $0x20] sm:$0xff] }
  0x19   : > { %1062 = vmatpush1.bf16.msra.mxu0 %v1061_v14  ;;  %1103 = vmatpush1.bf16.msra.mxu1 %v1061_v14  ;;  %v234_v46 = vld [vmem:[%s1372_s11 + $0x110] sm:$0xff]  ;;  %v237_v48 = vld [vmem:[%s1372_s11 + $0x128] sm:$0xff]  ;;  %v236_v50 = vld [vmem:[%s1372_s11 + $0x120] sm:$0xff] }
  0x1a   : > { %1063 = vmatprep.subr.bf16.mxu0 %v1291_v3  ;;  %1091 = vmatprep.subr.bf16.mxu1 %v1291_v3  ;;  %v207_v51 = vld [vmem:[%s1372_s11 + $0x38] sm:$0xff]  ;;  %v206_v53 = vld [vmem:[%s1372_s11 + $0x30] sm:$0xff]  ;;  %v209_v55 = vld [vmem:[%s1372_s11 + $0x48] sm:$0xff] }
  0x1b   : > { %v239_v52 = vld [vmem:[%s1372_s11 + $0x138] sm:$0xff]  ;;  %v238_v54 = vld [vmem:[%s1372_s11 + $0x130] sm:$0xff]  ;;  %v241_v56 = vld [vmem:[%s1372_s11 + $0x148] sm:$0xff] }
  0x1c   : > { %v208_v57 = vld [vmem:[%s1372_s11 + $0x40] sm:$0xff]  ;;  %v211_v59 = vld [vmem:[%s1372_s11 + $0x58] sm:$0xff]  ;;  %v210_v61 = vld [vmem:[%s1372_s11 + $0x50] sm:$0xff] }
  0x1d   : > { %1065 = vmatpush1.bf16.msra.mxu0 %v1064_v17  ;;  %1104 = vmatpush1.bf16.msra.mxu1 %v1064_v17  ;;  %v240_v58 = vld [vmem:[%s1372_s11 + $0x140] sm:$0xff]  ;;  %v243_v60 = vld [vmem:[%s1372_s11 + $0x158] sm:$0xff]  ;;  %v242_v62 = vld [vmem:[%s1372_s11 + $0x150] sm:$0xff] }
  0x1e   : > { %1066 = vmatprep.subr.bf16.mxu0 %v1291_v3  ;;  %1092 = vmatprep.subr.bf16.mxu1 %v1291_v3  ;;  %v213_v63 = vld [vmem:[%s1372_s11 + $0x68] sm:$0xff]  ;;  %v212_v1 = vld [vmem:[%s1372_s11 + $0x60] sm:$0xff]  ;;  %v247_v4 = vld [vmem:[%s1372_s11 + $0x178] sm:$0xff] }
  0x1f   : > { %v245_v0 = vld [vmem:[%s1372_s11 + $0x168] sm:$0xff]  ;;  %v244_v2 = vld [vmem:[%s1372_s11 + $0x160] sm:$0xff]  ;;  %v214_v5 = vld [vmem:[%s1372_s11 + $0x70] sm:$0xff] }
  0x20   : > { %v246_v6 = vld [vmem:[%s1372_s11 + $0x170] sm:$0xff]  ;;  %v217_v7 = vld [vmem:[%s1372_s11 + $0x88] sm:$0xff]  ;;  %v216_v9 = vld [vmem:[%s1372_s11 + $0x80] sm:$0xff] }
  0x21   : > { %1068 = vmatpush1.bf16.msra.mxu0 %v1067_v20  ;;  %1105 = vmatpush1.bf16.msra.mxu1 %v1067_v20  ;;  %v249_v8 = vld [vmem:[%s1372_s11 + $0x188] sm:$0xff]  ;;  %v248_v10 = vld [vmem:[%s1372_s11 + $0x180] sm:$0xff]  ;;  %v219_v11 = vld [vmem:[%s1372_s11 + $0x98] sm:$0xff] }
  0x22   : > { %1069 = vmatprep.subr.bf16.mxu0 %v1291_v3  ;;  %1093 = vmatprep.subr.bf16.mxu1 %v1291_v3  ;;  %v251_v12 = vld [vmem:[%s1372_s11 + $0x198] sm:$0xff]  ;;  %v218_v13 = vld [vmem:[%s1372_s11 + $0x90] sm:$0xff]  ;;  %v221_v15 = vld [vmem:[%s1372_s11 + $0xa8] sm:$0xff] }
  0x23   : > { %v250_v14 = vld [vmem:[%s1372_s11 + $0x190] sm:$0xff]  ;;  %v253_v16 = vld [vmem:[%s1372_s11 + $0x1a8] sm:$0xff]  ;;  %v220_v17 = vld [vmem:[%s1372_s11 + $0xa0] sm:$0xff] }
  0x24   : > { %v252_v18 = vld [vmem:[%s1372_s11 + $0x1a0] sm:$0xff]  ;;  %v223_v19 = vld [vmem:[%s1372_s11 + $0xb8] sm:$0xff]  ;;  %v222_v21 = vld [vmem:[%s1372_s11 + $0xb0] sm:$0xff] }
  0x25   : > { %1071 = vmatpush1.bf16.msra.mxu0 %v1070_v23  ;;  %1106 = vmatpush1.bf16.msra.mxu1 %v1070_v23  ;;  %v255_v20 = vld [vmem:[%s1372_s11 + $0x1b8] sm:$0xff]  ;;  %v254_v22 = vld [vmem:[%s1372_s11 + $0x1b0] sm:$0xff]  ;;  %v225_v23 = vld [vmem:[%s1372_s11 + $0xc8] sm:$0xff] }
  0x26   : > { %1072 = vmatprep.subr.bf16.mxu0 %v1291_v3  ;;  %1094 = vmatprep.subr.bf16.mxu1 %v1291_v3  ;;  %v257_v24 = vld [vmem:[%s1372_s11 + $0x1c8] sm:$0xff]  ;;  %v224_v25 = vld [vmem:[%s1372_s11 + $0xc0] sm:$0xff]  ;;  %v227_v27 = vld [vmem:[%s1372_s11 + $0xd8] sm:$0xff] }
  0x27   : > { %v259_v28 = vld [vmem:[%s1372_s11 + $0x1d8] sm:$0xff]  ;;  %v258_v30 = vld [vmem:[%s1372_s11 + $0x1d0] sm:$0xff]  ;;  %v229_v31 = vld [vmem:[%s1372_s11 + $0xe8] sm:$0xff] }
  0x28   : > { %v228_v33 = vld [vmem:[%s1372_s11 + $0xe0] sm:$0xff]  ;;  %v263_v36 = vld [vmem:[%s1372_s11 + $0x1f8] sm:$0xff]  ;;  %v230_v37 = vld [vmem:[%s1372_s11 + $0xf0] sm:$0xff] }
  0x29   : > { %1074 = vmatpush1.bf16.msra.mxu0 %v1073_v26  ;;  %1107 = vmatpush1.bf16.msra.mxu1 %v1073_v26  ;;  %v256_v26 = vld [vmem:[%s1372_s11 + $0x1c0] sm:$0xff] }
  0x2a   : > { %1075 = vmatprep.subr.bf16.mxu0 %v1291_v3  ;;  %1095 = vmatprep.subr.bf16.mxu1 %v1291_v3  ;;  %v260_v34 = vld [vmem:[%s1372_s11 + $0x1e0] sm:$0xff] }
  0x2d   : > { %1077 = vmatpush1.bf16.msra.mxu0 %v1076_v29  ;;  %1108 = vmatpush1.bf16.msra.mxu1 %v1076_v29  ;;  %v226_v29 = vld [vmem:[%s1372_s11 + $0xd0] sm:$0xff] }
  0x2e   : > { %1078 = vmatprep.subr.bf16.mxu0 %v1291_v3  ;;  %1096 = vmatprep.subr.bf16.mxu1 %v1291_v3 }
  0x31   : > { %1080 = vmatpush1.bf16.msra.mxu0 %v1079_v32  ;;  %1109 = vmatpush1.bf16.msra.mxu1 %v1079_v32  ;;  %v261_v32 = vld [vmem:[%s1372_s11 + $0x1e8] sm:$0xff] }
  0x32   : > { %1081 = vmatprep.subr.bf16.mxu0 %v1291_v3  ;;  %1097 = vmatprep.subr.bf16.mxu1 %v1291_v3 }
  0x35   : > { %1083 = vmatpush1.bf16.msra.mxu0 %v1082_v35  ;;  %1110 = vmatpush1.bf16.msra.mxu1 %v1082_v35  ;;  %v231_v35 = vld [vmem:[%s1372_s11 + $0xf8] sm:$0xff] }
  0x36   : > { %1084 = vmatprep.subr.bf16.mxu0 %v1291_v3  ;;  %1098 = vmatprep.subr.bf16.mxu1 %v1291_v3  ;;  %v215_v3 = vld [vmem:[%s1372_s11 + $0x78] sm:$0xff] }
  0x39   : > { %1086 = vmatpush1.bf16.msra.mxu0 %v1085_v38  ;;  %1111 = vmatpush1.bf16.msra.mxu1 %v1085_v38  ;;  %v262_v38 = vld [vmem:[%s1372_s11 + $0x1f0] sm:$0xff]  ;;  %s1048_s11 = sshll.u32 (%p1338_p4), %s1326_s15, 8 }
  0x3a   : > { %441 = vmatprep.subr.mxu0 %v1292_v39  ;;  %1099 = vmatprep.subr.mxu1 %v1292_v39  ;;  %v1551_v39 = vld [vmem:[%s1760_s2] ss:$0 sm:$0xff]  ;;  %s1626_s25 = scalar_lea.vmem (%p1338_p4), %s1761_s3, %s1048_s11  }
  0x3d   : > { %442 = vmatpush1.msra.mxu0 %v288_v40  ;;  %1112 = vmatpush1.msra.mxu1 %v288_v40 }
  0x3e   : > { %458 = vmatmul.mubr.f32.vlgmr.msra.gmra.mrb[0].mxu0 %v200_v41  ;;  %538 = vmatmul.mubr.f32.vlgmr.msra.gmra.mrb[0].mxu1 %v232_v42 }
  0x3f   : > { %999 = vmatprep.mubr.msk.f32.mxu0 %vm296_vm0, %v203_v43  ;;  %1015 = vmatprep.mubr.msk.f32.mxu1 %vm296_vm0, %v235_v44 }
  0x42   : > { %463 = vmatmul.mubr.f32.gmra.mrb[2].mxu0 %v202_v45  ;;  %543 = vmatmul.mubr.f32.gmra.mrb[2].mxu1 %v234_v46 }
  0x43   : > { %1000 = vmatprep.mubr.msk.f32.mxu0 %vm296_vm0, %v205_v47  ;;  %1016 = vmatprep.mubr.msk.f32.mxu1 %vm296_vm0, %v237_v48 }
  0x46   : > { %468 = vmatmul.mubr.f32.gmra.mrb[4].mxu0 %v204_v49  ;;  %548 = vmatmul.mubr.f32.gmra.mrb[4].mxu1 %v236_v50 }
  0x47   : > { %1001 = vmatprep.mubr.msk.f32.mxu0 %vm296_vm0, %v207_v51  ;;  %1017 = vmatprep.mubr.msk.f32.mxu1 %vm296_vm0, %v239_v52 }
  0x4a   : > { %473 = vmatmul.mubr.f32.gmra.mrb[6].mxu0 %v206_v53  ;;  %553 = vmatmul.mubr.f32.gmra.mrb[6].mxu1 %v238_v54 }
  0x4b   : > { %1002 = vmatprep.mubr.msk.f32.mxu0 %vm296_vm0, %v209_v55  ;;  %1018 = vmatprep.mubr.msk.f32.mxu1 %vm296_vm0, %v241_v56 }
  0x4e   : > { %478 = vmatmul.mubr.f32.gmra.mrb[8].mxu0 %v208_v57  ;;  %558 = vmatmul.mubr.f32.gmra.mrb[8].mxu1 %v240_v58 }
  0x4f   : > { %1003 = vmatprep.mubr.msk.f32.mxu0 %vm296_vm0, %v211_v59  ;;  %1019 = vmatprep.mubr.msk.f32.mxu1 %vm296_vm0, %v243_v60 }
  0x52   : > { %483 = vmatmul.mubr.f32.gmra.mrb[10].mxu0 %v210_v61  ;;  %563 = vmatmul.mubr.f32.gmra.mrb[10].mxu1 %v242_v62 }
  0x53   : > { %1004 = vmatprep.mubr.msk.f32.mxu0 %vm296_vm0, %v213_v63  ;;  %1020 = vmatprep.mubr.msk.f32.mxu1 %vm296_vm0, %v245_v0 }
  0x56   : > { %488 = vmatmul.mubr.f32.gmra.mrb[12].mxu0 %v212_v1  ;;  %568 = vmatmul.mubr.f32.gmra.mrb[12].mxu1 %v244_v2 }
  0x57   : > { %1005 = vmatprep.mubr.msk.f32.mxu0 %vm296_vm0, %v215_v3  ;;  %1021 = vmatprep.mubr.msk.f32.mxu1 %vm296_vm0, %v247_v4 }
  0x5a   : > { %493 = vmatmul.mubr.f32.gmra.mrb[14].mxu0 %v214_v5  ;;  %573 = vmatmul.mubr.f32.gmra.mrb[14].mxu1 %v246_v6 }
  0x5b   : > { %1006 = vmatprep.mubr.msk.f32.mxu0 %vm296_vm0, %v217_v7  ;;  %1022 = vmatprep.mubr.msk.f32.mxu1 %vm296_vm0, %v249_v8 }
  0x5e   : > { %498 = vmatmul.mubr.f32.gmra.mrb[16].mxu0 %v216_v9  ;;  %578 = vmatmul.mubr.f32.gmra.mrb[16].mxu1 %v248_v10 }
  0x5f   : > { %1007 = vmatprep.mubr.msk.f32.mxu0 %vm296_vm0, %v219_v11  ;;  %1023 = vmatprep.mubr.msk.f32.mxu1 %vm296_vm0, %v251_v12 }
  0x62   : > { %503 = vmatmul.mubr.f32.gmra.mrb[18].mxu0 %v218_v13  ;;  %583 = vmatmul.mubr.f32.gmra.mrb[18].mxu1 %v250_v14 }
  0x63   : > { %1008 = vmatprep.mubr.msk.f32.mxu0 %vm296_vm0, %v221_v15  ;;  %1024 = vmatprep.mubr.msk.f32.mxu1 %vm296_vm0, %v253_v16 }
  0x66   : > { %508 = vmatmul.mubr.f32.gmra.mrb[20].mxu0 %v220_v17  ;;  %588 = vmatmul.mubr.f32.gmra.mrb[20].mxu1 %v252_v18 }
  0x67   : > { %1009 = vmatprep.mubr.msk.f32.mxu0 %vm296_vm0, %v223_v19  ;;  %1025 = vmatprep.mubr.msk.f32.mxu1 %vm296_vm0, %v255_v20 }
  0x6a   : > { %513 = vmatmul.mubr.f32.gmra.mrb[22].mxu0 %v222_v21  ;;  %593 = vmatmul.mubr.f32.gmra.mrb[22].mxu1 %v254_v22 }
  0x6b   : > { %1010 = vmatprep.mubr.msk.f32.mxu0 %vm296_vm0, %v225_v23  ;;  %1026 = vmatprep.mubr.msk.f32.mxu1 %vm296_vm0, %v257_v24 }
  0x6e   : > { %518 = vmatmul.mubr.f32.gmra.mrb[24].mxu0 %v224_v25  ;;  %598 = vmatmul.mubr.f32.gmra.mrb[24].mxu1 %v256_v26 }
  0x6f   : > { %1011 = vmatprep.mubr.msk.f32.mxu0 %vm296_vm0, %v227_v27  ;;  %1027 = vmatprep.mubr.msk.f32.mxu1 %vm296_vm0, %v259_v28 }
  0x72   : > { %523 = vmatmul.mubr.f32.gmra.mrb[26].mxu0 %v226_v29  ;;  %603 = vmatmul.mubr.f32.gmra.mrb[26].mxu1 %v258_v30 }
  0x73   : > { %1012 = vmatprep.mubr.msk.f32.mxu0 %vm296_vm0, %v229_v31  ;;  %1028 = vmatprep.mubr.msk.f32.mxu1 %vm296_vm0, %v261_v32 }
  0x76   : > { %528 = vmatmul.mubr.f32.gmra.mrb[28].mxu0 %v228_v33  ;;  %608 = vmatmul.mubr.f32.gmra.mrb[28].mxu1 %v260_v34 }
  0x77   : > { %1013 = vmatprep.mubr.msk.f32.mxu0 %vm296_vm0, %v231_v35  ;;  %1029 = vmatprep.mubr.msk.f32.mxu1 %vm296_vm0, %v263_v36 }
  0x7a   : > { %533 = vmatmul.mubr.f32.gmra.mrb[30].mxu0 %v230_v37  ;;  %613 = vmatmul.mubr.f32.gmra.mrb[30].mxu1 %v262_v38 }
 0x111   : > { %v459_v40 = vpop.f32.mrb[0].mxu0  ;;  %v539_v41 = vpop.f32.mrb[0].mxu1 }
 0x112   : > { %v460_v42 = vadd.f32 %v1551_v39, %v459_v40  ;;  %v540_v43 = vadd.f32 %v1551_v39, %v539_v41  ;;  %v461_v44 = vpop.f32.mrb[1].mxu0  ;;  %v541_v45 = vpop.f32.mrb[1].mxu1 }
 0x114   : > { %618 = vst [vmem:[%s1555_s22] sm:$0xff] %v460_v42  ;;  %634 = vst [vmem:[%s1555_s22 + $0x80] sm:$0xff] %v540_v43 }
 0x115   : > { %v464_v46 = vpop.f32.mrb[2].mxu0  ;;  %v544_v47 = vpop.f32.mrb[2].mxu1 }
 0x116   : > { %v465_v48 = vadd.f32 %v1551_v39, %v464_v46  ;;  %v545_v49 = vadd.f32 %v1551_v39, %v544_v47  ;;  %v466_v50 = vpop.f32.mrb[3].mxu0  ;;  %v546_v51 = vpop.f32.mrb[3].mxu1 }
 0x118   : > { %619 = vst [vmem:[%s1555_s22 + $0x8] sm:$0xff] %v465_v48  ;;  %635 = vst [vmem:[%s1555_s22 + $0x88] sm:$0xff] %v545_v49 }
 0x119   : > { %v469_v52 = vpop.f32.mrb[4].mxu0  ;;  %v549_v53 = vpop.f32.mrb[4].mxu1 }
 0x11a   : > { %v470_v54 = vadd.f32 %v1551_v39, %v469_v52  ;;  %v550_v55 = vadd.f32 %v1551_v39, %v549_v53  ;;  %v471_v56 = vpop.f32.mrb[5].mxu0  ;;  %v551_v57 = vpop.f32.mrb[5].mxu1 }
 0x11c   : > { %620 = vst [vmem:[%s1555_s22 + $0x10] sm:$0xff] %v470_v54  ;;  %636 = vst [vmem:[%s1555_s22 + $0x90] sm:$0xff] %v550_v55 }
 0x11d   : > { %v474_v58 = vpop.f32.mrb[6].mxu0  ;;  %v554_v59 = vpop.f32.mrb[6].mxu1 }
 0x11e   : > { %v475_v60 = vadd.f32 %v1551_v39, %v474_v58  ;;  %v555_v61 = vadd.f32 %v1551_v39, %v554_v59  ;;  %v476_v62 = vpop.f32.mrb[7].mxu0  ;;  %v556_v63 = vpop.f32.mrb[7].mxu1 }
 0x120   : > { %621 = vst [vmem:[%s1555_s22 + $0x18] sm:$0xff] %v475_v60  ;;  %637 = vst [vmem:[%s1555_s22 + $0x98] sm:$0xff] %v555_v61 }
 0x121   : > { %v479_v0 = vpop.f32.mrb[8].mxu0  ;;  %v559_v1 = vpop.f32.mrb[8].mxu1 }
 0x122   : > { %v480_v2 = vadd.f32 %v1551_v39, %v479_v0  ;;  %v560_v3 = vadd.f32 %v1551_v39, %v559_v1  ;;  %v481_v4 = vpop.f32.mrb[9].mxu0  ;;  %v561_v5 = vpop.f32.mrb[9].mxu1 }
 0x124   : > { %622 = vst [vmem:[%s1555_s22 + $0x20] sm:$0xff] %v480_v2  ;;  %638 = vst [vmem:[%s1555_s22 + $0xa0] sm:$0xff] %v560_v3 }
 0x125   : > { %v484_v6 = vpop.f32.mrb[10].mxu0  ;;  %v564_v7 = vpop.f32.mrb[10].mxu1 }
 0x126   : > { %v485_v8 = vadd.f32 %v1551_v39, %v484_v6  ;;  %v565_v9 = vadd.f32 %v1551_v39, %v564_v7  ;;  %v486_v10 = vpop.f32.mrb[11].mxu0  ;;  %v566_v11 = vpop.f32.mrb[11].mxu1 }
 0x128   : > { %623 = vst [vmem:[%s1555_s22 + $0x28] sm:$0xff] %v485_v8  ;;  %639 = vst [vmem:[%s1555_s22 + $0xa8] sm:$0xff] %v565_v9 }
 0x129   : > { %v489_v12 = vpop.f32.mrb[12].mxu0  ;;  %v569_v13 = vpop.f32.mrb[12].mxu1 }
 0x12a   : > { %v490_v14 = vadd.f32 %v1551_v39, %v489_v12  ;;  %v570_v15 = vadd.f32 %v1551_v39, %v569_v13  ;;  %v491_v16 = vpop.f32.mrb[13].mxu0  ;;  %v571_v17 = vpop.f32.mrb[13].mxu1 }
 0x12c   : > { %624 = vst [vmem:[%s1555_s22 + $0x30] sm:$0xff] %v490_v14  ;;  %640 = vst [vmem:[%s1555_s22 + $0xb0] sm:$0xff] %v570_v15 }
 0x12d   : > { %v494_v18 = vpop.f32.mrb[14].mxu0  ;;  %v574_v19 = vpop.f32.mrb[14].mxu1 }
 0x12e   : > { %v495_v20 = vadd.f32 %v1551_v39, %v494_v18  ;;  %v575_v21 = vadd.f32 %v1551_v39, %v574_v19  ;;  %v496_v22 = vpop.f32.mrb[15].mxu0  ;;  %v576_v23 = vpop.f32.mrb[15].mxu1 }
 0x130   : > { %625 = vst [vmem:[%s1555_s22 + $0x38] sm:$0xff] %v495_v20  ;;  %641 = vst [vmem:[%s1555_s22 + $0xb8] sm:$0xff] %v575_v21 }
 0x131   : > { %v499_v24 = vpop.f32.mrb[16].mxu0  ;;  %v579_v25 = vpop.f32.mrb[16].mxu1 }
 0x132   : > { %v500_v26 = vadd.f32 %v1551_v39, %v499_v24  ;;  %v580_v27 = vadd.f32 %v1551_v39, %v579_v25  ;;  %v501_v28 = vpop.f32.mrb[17].mxu0  ;;  %v581_v29 = vpop.f32.mrb[17].mxu1 }
 0x134   : > { %626 = vst [vmem:[%s1555_s22 + $0x40] sm:$0xff] %v500_v26  ;;  %642 = vst [vmem:[%s1555_s22 + $0xc0] sm:$0xff] %v580_v27 }
 0x135   : > { %v504_v30 = vpop.f32.mrb[18].mxu0  ;;  %v584_v31 = vpop.f32.mrb[18].mxu1 }
 0x136   : > { %v505_v32 = vadd.f32 %v1551_v39, %v504_v30  ;;  %v585_v33 = vadd.f32 %v1551_v39, %v584_v31  ;;  %v506_v34 = vpop.f32.mrb[19].mxu0  ;;  %v586_v35 = vpop.f32.mrb[19].mxu1 }
 0x138   : > { %627 = vst [vmem:[%s1555_s22 + $0x48] sm:$0xff] %v505_v32  ;;  %643 = vst [vmem:[%s1555_s22 + $0xc8] sm:$0xff] %v585_v33 }
 0x139   : > { %v509_v36 = vpop.f32.mrb[20].mxu0  ;;  %v589_v37 = vpop.f32.mrb[20].mxu1 }
 0x13a   : > { %v510_v38 = vadd.f32 %v1551_v39, %v509_v36  ;;  %v590_v40 = vadd.f32 %v1551_v39, %v589_v37  ;;  %v511_v41 = vpop.f32.mrb[21].mxu0  ;;  %v591_v42 = vpop.f32.mrb[21].mxu1 }
 0x13c   : > { %628 = vst [vmem:[%s1555_s22 + $0x50] sm:$0xff] %v510_v38  ;;  %644 = vst [vmem:[%s1555_s22 + $0xd0] sm:$0xff] %v590_v40 }
 0x13d   : > { %v514_v43 = vpop.f32.mrb[22].mxu0  ;;  %v594_v44 = vpop.f32.mrb[22].mxu1 }
 0x13e   : > { %v515_v45 = vadd.f32 %v1551_v39, %v514_v43  ;;  %v595_v46 = vadd.f32 %v1551_v39, %v594_v44  ;;  %v516_v47 = vpop.f32.mrb[23].mxu0  ;;  %v596_v48 = vpop.f32.mrb[23].mxu1 }
 0x140   : > { %629 = vst [vmem:[%s1555_s22 + $0x58] sm:$0xff] %v515_v45  ;;  %645 = vst [vmem:[%s1555_s22 + $0xd8] sm:$0xff] %v595_v46 }
 0x141   : > { %v519_v49 = vpop.f32.mrb[24].mxu0  ;;  %v599_v50 = vpop.f32.mrb[24].mxu1 }
 0x142   : > { %v520_v51 = vadd.f32 %v1551_v39, %v519_v49  ;;  %v600_v52 = vadd.f32 %v1551_v39, %v599_v50  ;;  %v521_v53 = vpop.f32.mrb[25].mxu0  ;;  %v601_v54 = vpop.f32.mrb[25].mxu1 }
 0x144   : > { %630 = vst [vmem:[%s1555_s22 + $0x60] sm:$0xff] %v520_v51  ;;  %646 = vst [vmem:[%s1555_s22 + $0xe0] sm:$0xff] %v600_v52 }
 0x145   : > { %v524_v55 = vpop.f32.mrb[26].mxu0  ;;  %v604_v56 = vpop.f32.mrb[26].mxu1 }
 0x146   : > { %v525_v57 = vadd.f32 %v1551_v39, %v524_v55  ;;  %v605_v58 = vadd.f32 %v1551_v39, %v604_v56  ;;  %v526_v59 = vpop.f32.mrb[27].mxu0  ;;  %v606_v60 = vpop.f32.mrb[27].mxu1 }
 0x148   : > { %631 = vst [vmem:[%s1555_s22 + $0x68] sm:$0xff] %v525_v57  ;;  %647 = vst [vmem:[%s1555_s22 + $0xe8] sm:$0xff] %v605_v58 }
 0x149   : > { %v529_v61 = vpop.f32.mrb[28].mxu0  ;;  %v609_v62 = vpop.f32.mrb[28].mxu1 }
 0x14a   : > { %v530_v63 = vadd.f32 %v1551_v39, %v529_v61  ;;  %v610_v0 = vadd.f32 %v1551_v39, %v609_v62  ;;  %v531_v1 = vpop.f32.mrb[29].mxu0  ;;  %v611_v2 = vpop.f32.mrb[29].mxu1  ;;  %656 = sbr.rel (!%p1338_p4) target bundleno = 393 (0x189), region = 36 }
 0x14c   : > { %632 = vst [vmem:[%s1555_s22 + $0x70] sm:$0xff] %v530_v63  ;;  %648 = vst [vmem:[%s1555_s22 + $0xf0] sm:$0xff] %v610_v0 }
 0x14d   : > { %v534_v3 = vpop.f32.mrb[30].mxu0  ;;  %v614_v4 = vpop.f32.mrb[30].mxu1 }
 0x14e   : > { %v535_v5 = vadd.f32 %v1551_v39, %v534_v3  ;;  %v615_v6 = vadd.f32 %v1551_v39, %v614_v4  ;;  %v536_v7 = vpop.f32.mrb[31].mxu0  ;;  %v616_v8 = vpop.f32.mrb[31].mxu1 }
 0x150   : > { %633 = vst [vmem:[%s1555_s22 + $0x78] sm:$0xff] %v535_v5  ;;  %649 = vst [vmem:[%s1555_s22 + $0xf8] sm:$0xff] %v615_v6 }
 0x151   : > { %s1772_s12 = smov (!%p659_p8, %s658_s12), 32 }
 0x152   : > { %s1032_s26 = sshll.u32 %s1772_s12, 7 }
 0x153   : > { %p1035_p9 = scmp.eq.s32.totalorder %s1032_s26, 0 }
 0x154   : > { %s1632_s28 = sshrl.u32 (!%p1035_p9), %s1772_s12, 5 }
 0x155   : > { %667 = sbr.rel (%p1035_p9) target bundleno = 393 (0x189), region = 40  ;;  %p1036_p10 = scmp.le.s32.totalorder (!%p1035_p9), %s1632_s28, 0 }
 0x15c   : > { %945 = sbr.rel (%p1036_p10) target bundleno = 372 (0x174), region = 116  ;;  %s1763_s15 = smov (!%p1036_p10), %s1626_s25 }
 0x15d   : > { %s1764_s20 = smov (!%p1036_p10), %s1555_s22  ;;  %s1641_s27 = smov (!%p1036_p10), 0  }
 0x15e   : > { %s1643_s29 = smov (!%p1036_p10), 0  }
 0x163 LB: >> { %v791_v39 = vld [vmem:[%s1265_s20] sm:$0xff]  ;;  %v793_v9 = vld [vmem:[%s1265_s20 + $0x8] sm:$0xff]  ;;  %v795_v10 = vld [vmem:[%s1265_s20 + $0x10] sm:$0xff]  ;;  %s855_s30 = sadd.s32 1, %s1269_s27  ;;  %s785_s29 = sadd.s32 1, %s1273_s29   ;;  %s1273_s29 = sphi %s1643_s29, %s785_s29   ;;  %s1269_s27 = sphi %s1641_s27, %s1767_s27   ;;  %s1265_s20 = sphi %s1764_s20, %s1766_s20   ;;  %s1261_s15 = sphi %s1763_s15, %s1765_s15  }
 0x164   : >> { %792 = vst [vmem:[%s1261_s15] sm:$0xff] %v791_v39  ;;  %794 = vst [vmem:[%s1261_s15 + $0x8] sm:$0xff] %v793_v9  ;;  %v797_v11 = vld [vmem:[%s1265_s20 + $0x18] sm:$0xff]  ;;  %v799_v12 = vld [vmem:[%s1265_s20 + $0x20] sm:$0xff]  ;;  %p856_p11 = scmp.ge.s32.totalorder %s855_s30, %s1632_s28  ;;  %p784_p12 = scmp.ge.s32.totalorder %s785_s29, %s1632_s28 }
 0x165   : >> { %796 = vst [vmem:[%s1261_s15 + $0x10] sm:$0xff] %v795_v10  ;;  %v801_v13 = vld [vmem:[%s1265_s20 + $0x28] sm:$0xff]  ;;  %798 = vst [vmem:[%s1261_s15 + $0x18] sm:$0xff] %v797_v11  ;;  %v803_v14 = vld [vmem:[%s1265_s20 + $0x30] sm:$0xff] }
 0x166   : >> { %800 = vst [vmem:[%s1261_s15 + $0x20] sm:$0xff] %v799_v12  ;;  %802 = vst [vmem:[%s1261_s15 + $0x28] sm:$0xff] %v801_v13  ;;  %v805_v15 = vld [vmem:[%s1265_s20 + $0x38] sm:$0xff]  ;;  %v807_v16 = vld [vmem:[%s1265_s20 + $0x40] sm:$0xff]  ;;  %s1774_s30 = smov (%p856_p11, %s855_s30), 0 }
 0x167   : >> { %804 = vst [vmem:[%s1261_s15 + $0x30] sm:$0xff] %v803_v14  ;;  %806 = vst [vmem:[%s1261_s15 + $0x38] sm:$0xff] %v805_v15  ;;  %v809_v17 = vld [vmem:[%s1265_s20 + $0x48] sm:$0xff]  ;;  %v811_v18 = vld [vmem:[%s1265_s20 + $0x50] sm:$0xff]  ;;  %s1037_s4 = sshll.u32 %s1774_s30, 8  ;;  %s1767_s27 = smov %s1774_s30 }
 0x168   : >> { %808 = vst [vmem:[%s1261_s15 + $0x40] sm:$0xff] %v807_v16  ;;  %v813_v19 = vld [vmem:[%s1265_s20 + $0x58] sm:$0xff]  ;;  %810 = vst [vmem:[%s1261_s15 + $0x48] sm:$0xff] %v809_v17  ;;  %v815_v20 = vld [vmem:[%s1265_s20 + $0x60] sm:$0xff]  ;;  %s1699_s5 = scalar_lea.vmem %s1555_s22, %s1037_s4 [#allocation2]   ;;  %s861_s6 = scalar_lea.vmem %s1626_s25, %s1037_s4  }
 0x169   : >> { %812 = vst [vmem:[%s1261_s15 + $0x50] sm:$0xff] %v811_v18  ;;  %814 = vst [vmem:[%s1261_s15 + $0x58] sm:$0xff] %v813_v19  ;;  %v817_v21 = vld [vmem:[%s1265_s20 + $0x68] sm:$0xff]  ;;  %v819_v22 = vld [vmem:[%s1265_s20 + $0x70] sm:$0xff] }
 0x16a   : >> { %816 = vst [vmem:[%s1261_s15 + $0x60] sm:$0xff] %v815_v20  ;;  %818 = vst [vmem:[%s1261_s15 + $0x68] sm:$0xff] %v817_v21  ;;  %v821_v23 = vld [vmem:[%s1265_s20 + $0x78] sm:$0xff]  ;;  %v823_v24 = vld [vmem:[%s1265_s20 + $0x80] sm:$0xff] }
 0x16b   : >> { %820 = vst [vmem:[%s1261_s15 + $0x70] sm:$0xff] %v819_v22  ;;  %v825_v25 = vld [vmem:[%s1265_s20 + $0x88] sm:$0xff]  ;;  %822 = vst [vmem:[%s1261_s15 + $0x78] sm:$0xff] %v821_v23  ;;  %v827_v26 = vld [vmem:[%s1265_s20 + $0x90] sm:$0xff] }
 0x16c   : >> { %824 = vst [vmem:[%s1261_s15 + $0x80] sm:$0xff] %v823_v24  ;;  %826 = vst [vmem:[%s1261_s15 + $0x88] sm:$0xff] %v825_v25  ;;  %v829_v27 = vld [vmem:[%s1265_s20 + $0x98] sm:$0xff]  ;;  %v831_v28 = vld [vmem:[%s1265_s20 + $0xa0] sm:$0xff] }
 0x16d   : >> { %828 = vst [vmem:[%s1261_s15 + $0x90] sm:$0xff] %v827_v26  ;;  %830 = vst [vmem:[%s1261_s15 + $0x98] sm:$0xff] %v829_v27  ;;  %v833_v29 = vld [vmem:[%s1265_s20 + $0xa8] sm:$0xff]  ;;  %v835_v30 = vld [vmem:[%s1265_s20 + $0xb0] sm:$0xff]  ;;  %787 = sbr.rel (!%p784_p12) target bundleno = 355 (0x163), region = 122 }
 0x16e   : >> { %832 = vst [vmem:[%s1261_s15 + $0xa0] sm:$0xff] %v831_v28  ;;  %v837_v31 = vld [vmem:[%s1265_s20 + $0xb8] sm:$0xff]  ;;  %834 = vst [vmem:[%s1261_s15 + $0xa8] sm:$0xff] %v833_v29  ;;  %v839_v32 = vld [vmem:[%s1265_s20 + $0xc0] sm:$0xff] }
 0x16f   : >> { %836 = vst [vmem:[%s1261_s15 + $0xb0] sm:$0xff] %v835_v30  ;;  %838 = vst [vmem:[%s1261_s15 + $0xb8] sm:$0xff] %v837_v31  ;;  %v841_v33 = vld [vmem:[%s1265_s20 + $0xc8] sm:$0xff]  ;;  %v843_v34 = vld [vmem:[%s1265_s20 + $0xd0] sm:$0xff] }
 0x170   : >> { %840 = vst [vmem:[%s1261_s15 + $0xc0] sm:$0xff] %v839_v32  ;;  %842 = vst [vmem:[%s1261_s15 + $0xc8] sm:$0xff] %v841_v33  ;;  %v845_v35 = vld [vmem:[%s1265_s20 + $0xd8] sm:$0xff]  ;;  %v847_v36 = vld [vmem:[%s1265_s20 + $0xe0] sm:$0xff] }
 0x171   : >> { %844 = vst [vmem:[%s1261_s15 + $0xd0] sm:$0xff] %v843_v34  ;;  %v849_v37 = vld [vmem:[%s1265_s20 + $0xe8] sm:$0xff]  ;;  %846 = vst [vmem:[%s1261_s15 + $0xd8] sm:$0xff] %v845_v35  ;;  %v851_v38 = vld [vmem:[%s1265_s20 + $0xf0] sm:$0xff] }
 0x172   : >> { %848 = vst [vmem:[%s1261_s15 + $0xe0] sm:$0xff] %v847_v36  ;;  %850 = vst [vmem:[%s1261_s15 + $0xe8] sm:$0xff] %v849_v37  ;;  %v853_v40 = vld [vmem:[%s1265_s20 + $0xf8] sm:$0xff]  ;;  %s1766_s20 = smov %s1699_s5 }
 0x173   : >> { %852 = vst [vmem:[%s1261_s15 + $0xf0] sm:$0xff] %v851_v38  ;;  %854 = vst [vmem:[%s1261_s15 + $0xf8] sm:$0xff] %v853_v40  ;;  %s1765_s15 = smov %s861_s6 }
 0x174 PF: > { %s1740_s7 = sand.u32 31, %s1772_s12   ;;  %s1049_s8 = sshll.u32 %s1632_s28, 8 }
 0x175   : > { %s866_s9 = scalar_lea.vmem %s1555_s22, %s1049_s8 [#allocation2]   ;;  %s868_s10 = scalar_lea.vmem %s1626_s25, %s1049_s8  }
 0x176   : > { %p1042_p13 = scmp.le.s32.totalorder %s1740_s7, 0 }
 0x177   : > { %s1275_s14 = smov (!%p1042_p13), %s868_s10   ;;  %s1279_s17 = smov (!%p1042_p13), %s866_s9  }
 0x178   : > { %959 = sbr.rel (%p1042_p13) target bundleno = 393 (0x189), region = 127  ;;  %s1283_s18 = smov (!%p1042_p13), 0  }
 0x179   : > { %s1287_s21 = smov (!%p1042_p13), 0  }
 0x17f LB: >> { %v878_v41 = vld [vmem:[%s1281_s17] sm:$0xff]  ;;  %s880_s12 = sadd.s32 1, %s1285_s18  ;;  %s872_s21 = sadd.s32 1, %s1289_s21   ;;  %s1289_s21 = sphi %s1287_s21, %s872_s21   ;;  %s1285_s18 = sphi %s1283_s18, %s1284_s18   ;;  %s1281_s17 = sphi %s1279_s17, %s885_s17   ;;  %s1277_s14 = sphi %s1275_s14, %s886_s14  }
 0x180   : >> { %879 = vst [vmem:[%s1277_s14] sm:$0xff] %v878_v41  ;;  %p881_p0 = scmp.ge.s32.totalorder %s880_s12, %s1740_s7  ;;  %p871_p1 = scmp.ge.s32.totalorder %s872_s21, %s1740_s7 }
 0x182   : >> { %s1776_s12 = smov (%p881_p0, %s880_s12), 0  ;;  %874 = sbr.rel (!%p871_p1) target bundleno = 383 (0x17f), region = 133 }
 0x183   : >> { %s1043_s22 = sshll.u32 %s1776_s12, 3  ;;  %s1284_s18 = smov %s1776_s12  }
 0x184   : >> { %s885_s17 = scalar_lea.vmem %s866_s9, %s1043_s22 [#allocation2]   ;;  %s886_s14 = scalar_lea.vmem %s868_s10, %s1043_s22  }
 0x189 PF: > { %p10_p2 = scmp.ge.s32.totalorder %s1328_s16, 4   ;;  %s1768_s12 = smov %s1253_s13 }
 0x18a   : > { %s1769_s13 = smov %s1336_s19  ;;  %s1770_s14 = smov %s1328_s16 }
 0x18b   :  { %12 = sbr.rel (!%p10_p2) target bundleno = 2 (0x2), region = 144 }

</bundles_post_ra>
